<compile_context>
chip_gen: v6e
topology: v6e:2x2x1
jax: 0.10.0
libtpu: 0.0.40
codegen_flags: <defaults>
</compile_context>

<pallas_src>
import functools
import math

import jax
import jax.numpy as jnp
import numpy as np
from jax.experimental import pallas as pl
from jax.experimental.pallas import tpu as pltpu


# ----------------------------------------------------------------------------
# helpers
# ----------------------------------------------------------------------------
def _pick_tile(n, preferred):
    """Largest power-of-two tile <= preferred that divides n, else the full dim."""
    for t in (512, 256, 128, 64, 32, 16, 8):
        if t <= preferred and n % t == 0:
            return t
    # TODO(synk): for large sequence lengths not divisible by 8, pad in the
    # wrapper instead of falling back to a full (unblocked) dimension.
    return n


def _vmem_limit_bytes(working_set_bytes):
    # Explicit scoped-VMEM budget (review item): floor at the 32 MiB v6e/v7x
    # default, stay well below v7x's 64 MiB physical VMEM.
    return int(min(max(2 * working_set_bytes, 32 * 1024 * 1024), 56 * 1024 * 1024))


# ----------------------------------------------------------------------------
# 1) fused QKV projection: grid = (projection, M tiles); M = batch*seq
# ----------------------------------------------------------------------------
def _proj_kernel(x_ref, w_ref, o_ref):
    # x_ref: (1, tm, D), w_ref: (1, D, D) (already [in, out] and, for W_q,
    # pre-scaled by 1/sqrt(d_k)).  f32 accumulation on the MXU.
    o_ref[0] = jnp.dot(x_ref[0], w_ref[0],
                       preferred_element_type=jnp.float32).astype(o_ref.dtype)


def _stacked_project(x_stk, w_stk):
    """x_stk: (P, M, D), w_stk: (P, D, N) -> (P, M, N). One call for all projections."""
    P, M, D = x_stk.shape
    N = w_stk.shape[-1]
    tm = _pick_tile(M, 256)           # MXU-shaped M tile (256 v6e/v7x; 128-ok on v5e)
    isz = jnp.dtype(x_stk.dtype).itemsize
    demand = 2 * (tm * D + D * N + tm * N) * isz + tm * N * 4
    return pl.pallas_call(
        _proj_kernel,
        out_shape=jax.ShapeDtypeStruct((P, M, N), x_stk.dtype),
        grid_spec=pltpu.PrefetchScalarGridSpec(
            num_scalar_prefetch=0,
            grid=(P, M // tm),
            in_specs=[
                pl.BlockSpec((1, tm, D), lambda p, m: (p, m, 0)),
                pl.BlockSpec((1, D, N), lambda p, m: (p, 0, 0)),
            ],
            out_specs=pl.BlockSpec((1, tm, N), lambda p, m: (p, m, 0)),
        ),
        compiler_params=pltpu.CompilerParams(
            dimension_semantics=("parallel", "parallel"),
            vmem_limit_bytes=_vmem_limit_bytes(demand)),
    )(x_stk, w_stk)


# ----------------------------------------------------------------------------
# 2) flash attention: grid = (batch*head, q tiles, k tiles), online softmax
# ----------------------------------------------------------------------------
def _flash_attn_kernel(q_ref, k_ref, v_ref, o_ref, m_sc, l_sc, acc_sc, *,
                       approx_recip):
    ki = pl.program_id(2)

    @pl.when(ki == 0)
    def _():
        m_sc[...] = jnp.full_like(m_sc, -jnp.inf)
        l_sc[...] = jnp.zeros_like(l_sc)
        acc_sc[...] = jnp.zeros_like(acc_sc)

    q = q_ref[0]            # (tq, d_k), already scaled by 1/sqrt(d_k) via W_q
    k = k_ref[0]            # (tk, d_k)
    v = v_ref[0]            # (tk, d_k)

    # scores = q @ k^T, contracting d_k directly (no materialized transpose).
    s = jax.lax.dot_general(q, k, (((1,), (1,)), ((), ())),
                            preferred_element_type=jnp.float32)      # (tq, tk) f32
    # TODO(synk): optional attention mask not wired in (module's mask=None path);
    # dropout on attention weights is identity in eval mode.

    m_prev = m_sc[...]
    m_new = jnp.maximum(m_prev, jnp.max(s, axis=-1, keepdims=True))
    alpha = jnp.exp(m_prev - m_new)
    p = jnp.exp(s - m_new)
    l_sc[...] = alpha * l_sc[...] + jnp.sum(p, axis=-1, keepdims=True)
    acc_sc[...] = alpha * acc_sc[...] + jnp.dot(
        p.astype(v.dtype), v, preferred_element_type=jnp.float32)
    m_sc[...] = m_new

    @pl.when(ki == pl.num_programs(2) - 1)
    def _():
        if approx_recip:
            out = acc_sc[...] * pl.reciprocal(l_sc[...], approx=True)  # EUP slot
        else:
            out = acc_sc[...] / l_sc[...]
        o_ref[0] = out.astype(o_ref.dtype)


def _flash_attention(Qh, Kh, Vh, *, out_dtype, approx_recip):
    """Qh: (B*H, S_q, d_k), Kh/Vh: (B*H, S_k, d_k) -> (B*H, S_q, d_k)."""
    BH, Sq, d_k = Qh.shape
    Sk = Kh.shape[1]
    tq = _pick_tile(Sq, 256)
    tk = _pick_tile(Sk, 512)
    isz = jnp.dtype(Qh.dtype).itemsize
    demand = (2 * (tq * d_k + 2 * tk * d_k + tq * d_k) * isz   # double-buffered blocks
              + (tq * d_k + 2 * tq) * 4                         # f32 scratch
              + 4 * tq * tk * 4)                                # score/exp temporaries
    kernel = functools.partial(_flash_attn_kernel, approx_recip=approx_recip)
    return pl.pallas_call(
        kernel,
        out_shape=jax.ShapeDtypeStruct((BH, Sq, d_k), out_dtype),
        grid_spec=pltpu.PrefetchScalarGridSpec(
            num_scalar_prefetch=0,
            grid=(BH, Sq // tq, Sk // tk),
            in_specs=[
                pl.BlockSpec((1, tq, d_k), lambda bh, qi, ki: (bh, qi, 0)),
                pl.BlockSpec((1, tk, d_k), lambda bh, qi, ki: (bh, ki, 0)),
                pl.BlockSpec((1, tk, d_k), lambda bh, qi, ki: (bh, ki, 0)),
            ],
            out_specs=pl.BlockSpec((1, tq, d_k), lambda bh, qi, ki: (bh, qi, 0)),
            scratch_shapes=[
                pltpu.VMEM((tq, 1), jnp.float32),     # running max
                pltpu.VMEM((tq, 1), jnp.float32),     # running denom
                pltpu.VMEM((tq, d_k), jnp.float32),   # output accumulator
            ]),
        compiler_params=pltpu.CompilerParams(
            dimension_semantics=("parallel", "parallel", "arbitrary"),
            vmem_limit_bytes=_vmem_limit_bytes(demand)),
    )(Qh, Kh, Vh)


# ----------------------------------------------------------------------------
# 3) output projection (+ bias): grid = (M tiles,), constant blocks single-buffered
# ----------------------------------------------------------------------------
def _out_proj_kernel(x_ref, w_ref, b_ref, o_ref):
    acc = jnp.dot(x_ref[...], w_ref[...], preferred_element_type=jnp.float32)
    o_ref[...] = (acc + b_ref[...]).astype(o_ref.dtype)


def _out_projection(x2d, w_t, b, *, out_dtype):
    M, D = x2d.shape
    N = w_t.shape[-1]
    tm = _pick_tile(M, 256)
    isz = jnp.dtype(x2d.dtype).itemsize
    demand = 2 * tm * D * isz + (D * N + N) * isz + 2 * tm * N * 4
    return pl.pallas_call(
        _out_proj_kernel,
        out_shape=jax.ShapeDtypeStruct((M, N), out_dtype),
        grid_spec=pltpu.PrefetchScalarGridSpec(
            num_scalar_prefetch=0,
            grid=(M // tm,),
            in_specs=[
                pl.BlockSpec((tm, D), lambda m: (m, 0)),
                # Constant-index blocks: single-buffer them (halves weight VMEM).
                pl.BlockSpec((D, N), lambda m: (0, 0), pipeline_mode=pl.Buffered(1)),
                pl.BlockSpec((1, N), lambda m: (0, 0), pipeline_mode=pl.Buffered(1)),
            ],
            out_specs=pl.BlockSpec((tm, N), lambda m: (m, 0)),
        ),
        compiler_params=pltpu.CompilerParams(
            dimension_semantics=("parallel",),
            vmem_limit_bytes=_vmem_limit_bytes(demand)),
    )(x2d, w_t, b)


# ----------------------------------------------------------------------------
# public wrapper — mirrors MultiHeadAttention.forward (eval mode, mask=None)
# ----------------------------------------------------------------------------
def multi_head_attention(query, key, value, params, *, num_heads,
                         compute_dtype=jnp.bfloat16):
    """query/key/value: [B, S, D]. params: W_q/W_k/W_v/W_o in PyTorch [out, in]
    layout plus b_o.  compute_dtype: MXU operand dtype (bf16 production default,
    f32 accumulation always)."""
    B, Sq, D = query.shape
    Sk = key.shape[1]
    assert D % num_heads == 0
    d_k = D // num_heads
    cd = jnp.dtype(compute_dtype)
    approx_recip = cd != jnp.dtype(jnp.float32)

    # Pre-transpose [out,in] -> [in,out] ONCE; fold 1/sqrt(d_k) into W_q (free).
    wq_t = (params["W_q"].T / float(math.sqrt(d_k))).astype(cd)
    wk_t = params["W_k"].T.astype(cd)
    wv_t = params["W_v"].T.astype(cd)
    wo_t = params["W_o"].T.astype(cd)
    bo = params["b_o"].reshape(1, D).astype(jnp.float32)

    # Fold batch+seq into M so the projection matmuls fill the MXU.
    q2d = query.reshape(B * Sq, D).astype(cd)
    k2d = key.reshape(B * Sk, D).astype(cd)
    v2d = value.reshape(B * Sk, D).astype(cd)

    if Sq == Sk:
        qkv = _stacked_project(jnp.stack([q2d, k2d, v2d]),
                               jnp.stack([wq_t, wk_t, wv_t]))
        Q2, K2, V2 = qkv[0], qkv[1], qkv[2]
    else:
        Q2 = _stacked_project(q2d[None], wq_t[None])[0]
        kv = _stacked_project(jnp.stack([k2d, v2d]), jnp.stack([wk_t, wv_t]))
        K2, V2 = kv[0], kv[1]

    # Head split ONCE at the XLA level (outside the kernels) -> (B*H, S, d_k).
    def split_heads(x2d, S):
        return (x2d.reshape(B, S, num_heads, d_k)
                   .transpose(0, 2, 1, 3)
                   .reshape(B * num_heads, S, d_k))

    Qh, Kh, Vh = split_heads(Q2, Sq), split_heads(K2, Sk), split_heads(V2, Sk)

    ctx = _flash_attention(Qh, Kh, Vh, out_dtype=cd, approx_recip=approx_recip)

    # Merge heads (XLA level) and apply the output projection + bias.
    attn2d = (ctx.reshape(B, num_heads, Sq, d_k)
                 .transpose(0, 2, 1, 3)
                 .reshape(B * Sq, D))
    out2d = _out_projection(attn2d, wo_t, bo, out_dtype=query.dtype)
    # TODO(synk): at production sizes pad D (and d_k) to multiples of 128 so all
    # output stores are lane-dense full vst (demo D=32/d_k=4 uses masked stores).
    return out2d.reshape(B, Sq, D)


# ----------------------------------------------------------------------------
# pure-JAX reference matching the PyTorch module (eval mode, mask=None)
# ----------------------------------------------------------------------------
def _reference(query, key, value, params, *, num_heads):
    B, S_q, D = query.shape
    d_k = D // num_heads
    hp = jax.lax.Precision.HIGHEST
    Q = jnp.einsum("bsd,od->bso", query, params["W_q"], precision=hp)
    K = jnp.einsum("bsd,od->bso", key, params["W_k"], precision=hp)
    V = jnp.einsum("bsd,od->bso", value, params["W_v"], precision=hp)

    def split(x):
        return x.reshape(B, -1, num_heads, d_k).transpose(0, 2, 1, 3)

    Qh, Kh, Vh = split(Q), split(K), split(V)
    scores = jnp.einsum("bhqd,bhkd->bhqk", Qh, Kh,
                        precision=hp) / jnp.sqrt(jnp.float32(d_k))
    w = jax.nn.softmax(scores, axis=-1)
    out = jnp.einsum("bhqk,bhkd->bhqd", w, Vh, precision=hp)
    out = out.transpose(0, 2, 1, 3).reshape(B, S_q, D)
    return jnp.einsum("bsd,od->bso", out, params["W_o"], precision=hp) + params["b_o"]


if __name__ == "__main__":
    d_model, num_heads = 32, 8
    B, S = 2, 8

    key0 = jax.random.PRNGKey(0)
    ks = jax.random.split(key0, 8)
    bound = 1.0 / np.sqrt(d_model)   # PyTorch nn.Linear default init range
    params = {
        "W_q": jax.random.uniform(ks[0], (d_model, d_model), jnp.float32, -bound, bound),
        "W_k": jax.random.uniform(ks[1], (d_model, d_model), jnp.float32, -bound, bound),
        "W_v": jax.random.uniform(ks[2], (d_model, d_model), jnp.float32, -bound, bound),
        "W_o": jax.random.uniform(ks[3], (d_model, d_model), jnp.float32, -bound, bound),
        "b_o": jax.random.uniform(ks[4], (d_model,), jnp.float32, -bound, bound),
    }
    query = jax.random.normal(ks[5], (B, S, d_model), jnp.float32)
    key_in = jax.random.normal(ks[6], (B, S, d_model), jnp.float32)
    value = jax.random.normal(ks[7], (B, S, d_model), jnp.float32)

    ref = jax.block_until_ready(
        _reference(query, key_in, value, params, num_heads=num_heads))

    # f32 validation path (exact division, no bf16 rounding): tight tolerance.
    out_f32 = jax.block_until_ready(
        multi_head_attention(query, key_in, value, params,
                             num_heads=num_heads, compute_dtype=jnp.float32))
    np.testing.assert_allclose(np.asarray(out_f32), np.asarray(ref),
                               rtol=2e-3, atol=2e-3)

    # Production path: bf16 MXU operands (f32 accumulation) + EUP approx
    # reciprocal in the softmax denominator -> looser tolerance.
    out_bf16 = jax.block_until_ready(
        multi_head_attention(query, key_in, value, params,
                             num_heads=num_heads, compute_dtype=jnp.bfloat16))
    np.testing.assert_allclose(np.asarray(out_bf16), np.asarray(ref),
                               rtol=3e-2, atol=3e-2)

    print("KERNEL_OK")
</pallas_src>

<mosaic_0001>
module attributes {stable_mosaic.version = 11 : i64} {
  func.func @_proj_kernel(%arg0: i32, %arg1: i32, %arg2: memref<1x16x32xf32, #tpu.memory_space<vmem>>, %arg3: memref<1x32x32xf32, #tpu.memory_space<vmem>>, %arg4: memref<1x16x32xf32, #tpu.memory_space<vmem>>) attributes {dimension_semantics = [#tpu.dimension_semantics<parallel>, #tpu.dimension_semantics<parallel>], iteration_bounds = array<i64: 3, 1>, scalar_prefetch = 0 : i64, scratch_operands = 0 : i64, tpu.core_type = #tpu.core_type<tc>, window_params = [{transform_indices = @transform_0, window_bounds = array<i64: 1, 16, 32>}, {transform_indices = @transform_1, window_bounds = array<i64: 1, 32, 32>}, {transform_indices = @transform_2, window_bounds = array<i64: 1, 16, 32>}]} {
    %c0 = arith.constant 0 : index
    %c0_0 = arith.constant 0 : index
    %c0_1 = arith.constant 0 : index
    %0 = vector.load %arg2[%c0, %c0_0, %c0_1] : memref<1x16x32xf32, #tpu.memory_space<vmem>>, vector<1x16x32xf32>
    %1 = vector.shape_cast %0 : vector<1x16x32xf32> to vector<16x32xf32>
    %c0_2 = arith.constant 0 : index
    %c0_3 = arith.constant 0 : index
    %c0_4 = arith.constant 0 : index
    %2 = vector.load %arg3[%c0_2, %c0_3, %c0_4] : memref<1x32x32xf32, #tpu.memory_space<vmem>>, vector<1x32x32xf32>
    %3 = vector.shape_cast %2 : vector<1x32x32xf32> to vector<32x32xf32>
    %cst = arith.constant dense<0.000000e+00> : vector<16x32xf32>
    %4 = tpu.matmul %1, %3, %cst {dimension_numbers = #tpu.dot_dimension_numbers<[1], [0], [0], [1], [0, 0, 1, 1], [], []>} : vector<16x32xf32>, vector<32x32xf32>, vector<16x32xf32> -> vector<16x32xf32>
    %c0_5 = arith.constant 0 : index
    %c0_6 = arith.constant 0 : index
    %c0_7 = arith.constant 0 : index
    %5 = vector.load %arg4[%c0_5, %c0_6, %c0_7] : memref<1x16x32xf32, #tpu.memory_space<vmem>>, vector<1x16x32xf32>
    %6 = vector.shape_cast %5 : vector<1x16x32xf32> to vector<16x32xf32>
    %7 = vector.shape_cast %4 : vector<16x32xf32> to vector<1x16x32xf32>
    tpu.vector_store %arg4[%c0_5, %c0_6, %c0_7], %7 {strides = array<i32>} : memref<1x16x32xf32, #tpu.memory_space<vmem>>, vector<1x16x32xf32>,
    return
  }
  func.func @transform_0(%arg0: i32, %arg1: i32) -> (i32, i32, i32) {
    %c0_i32 = arith.constant 0 : i32
    %c0_i32_0 = arith.constant 0 : i32
    return %arg0, %arg1, %c0_i32 : i32, i32, i32
  }
  func.func @transform_1(%arg0: i32, %arg1: i32) -> (i32, i32, i32) {
    %c0_i32 = arith.constant 0 : i32
    %c0_i32_0 = arith.constant 0 : i32
    %c0_i32_1 = arith.constant 0 : i32
    return %arg0, %c0_i32, %c0_i32_0 : i32, i32, i32
  }
  func.func @transform_2(%arg0: i32, %arg1: i32) -> (i32, i32, i32) {
    %c0_i32 = arith.constant 0 : i32
    %c0_i32_0 = arith.constant 0 : i32
    return %arg0, %arg1, %c0_i32 : i32, i32, i32
  }
}

</mosaic_0001>

<bundles_post_ra>
// kernel: tpu_custom_call.1
= control target key start
LH: loop header
LB: loop body
LE: loop exit
PB: predicated region body
PF: predicated region fallthrough
CT: control target
= control target key end

     0   :  { %7 = vsyncpa [#allocation3], 0  ;;  %s892_s0 = inlined_call_operand.hbm [shape: f32[3,16,32], index: 0, kind: input, shape index: {}]   ;;  %s893_s1 = inlined_call_operand.hbm [shape: f32[3,32,32], index: 1, kind: input, shape index: {}]   ;;  %s894_s2 = inlined_call_operand.hbm [shape: f32[3,16,32], index: 2, kind: output, shape index: {}]  }
   0x1   :  { %9 = vsyncpa [#allocation3 + $0x1], 0 }
   0x2   :  { %10 = vsyncpa [#allocation6], 0 }
   0x3   :  { %12 = vsyncpa [#allocation6 + $0x1], 0 }
   0x4   :  { %13 = vsyncpa [#allocation4], 0 }
   0x5   :  { %15 = vsyncpa [#allocation4 + $0x1], 0  ;;  %s714_s9 = smov 0   ;;  %s716_s10 = smov 0  }
   0x6   :  { %s718_s11 = smov 0   ;;  %s720_s12 = smov 0  }
   0x7   :  { %s722_s13 = smov 0   ;;  %s724_s14 = smov 0  }
   0x8 LB: > { %s438_s15 = sadd.s32 4294967295, %s690_s14   ;;  %s439_s16 = sadd.s32 4294967294, %s690_s14   ;;  %s690_s14 = sphi %s724_s14, %s21_s14   ;;  %s686_s13 = sphi %s722_s13, %s905_s13   ;;  %s682_s12 = sphi %s720_s12, %s904_s12   ;;  %s678_s11 = sphi %s718_s11, %s903_s11   ;;  %s674_s10 = sphi %s716_s10, %s902_s10   ;;  %s670_s9 = sphi %s714_s9, %s901_s9  }
   0x9   : > { %s33_s17 = sadd.s32 1, %s686_s13  ;;  %s42_s18 = sadd.s32 1, %s678_s11 }
   0xa   : > { %p35_p0 = scmp.ge.s32.totalorder %s33_s17, 3  ;;  %p49_p1 = scmp.ne.s32.totalorder %s678_s11, %s674_s10 }
   0xb   : > { %p50_p2 = scmp.eq.s32.totalorder %s690_s14, 0  ;;  %p55_p3 = scmp.ne.s32.totalorder %s674_s10, %s670_s9 }
   0xc   : > { %s907_s17 = smov (%p35_p0, %s33_s17), 0  ;;  %p56_p5 = scmp.eq.s32.totalorder %s438_s15, 0 }
   0xd   : > { %p755_p4 = por %p50_p2, %p49_p1  ;;  %s37_s20 = ssub.s32 %s686_s13, %s907_s17 }
   0xe   : > { %p107_p6 = scmp.eq.s32.totalorder %s438_s15, 2  ;;  %p40_p7 = scmp.eq.s32.totalorder %s37_s20, 0 }
   0xf   : > { %p761_p8 = por %p56_p5, %p55_p3  ;;  %p113_p10 = scmp.eq.s32.totalorder %s439_s16, 2 }
  0x10   : > { %p765_p9 = por %p107_p6, %p49_p1  ;;  %p496_p12 = scmp.lt.s32.totalorder %s690_s14, 3 }
  0x11   : > { %s770_s23 = scalar_select %p40_p7, %s678_s11, %s42_s18  }
  0x12   : > { %p772_p11 = por %p113_p10, %p55_p3  ;;  %s778_s25 = sand.u32 1, %s678_s11  }
  0x13   : > { %s442_s26 = sshll.u32 %s778_s25, 4  ;;  %s459_s27 = sshll.u32 %s686_s13, 8 }
  0x14   : > { %s145_s30 = scalar_lea.hbm %s892_s0, %s459_s27  ;;  %s137_s3 = scalar_lea.vmem [#allocation2], %s442_s26 }
  0x15   : > { %s146_s4 = sshll.u32 %s137_s3, 4  ;;  %p787_p13 = pnand %p496_p12, %p755_p4  ;;  %s147_s4 = int_to_ptr.vmem [resolvable:$true] %s146_s4 }
  0x16   : > { %p448_p0 = scmp.ge.s32.totalorder %s690_s14, 1  ;;  %s134_s6 = scalar_lea.sflag [#allocation3], %s778_s25 }
  0x17   : > { %p552_p1 = pneg %p787_p13  ;;  %s563_s7 = scalar_lea.vmem %s147_s4, 256 }
  0x18   : > { %p564_p2 = scmp.ne.s32.totalorder %s147_s4, %s563_s7  ;;  %s692_s8 = smov [#allocation2]  }
  0x19   : > { %s568_s15 = sshll.u32 %s692_s8, 4  ;;  %s569_s15 = int_to_ptr.vmem [resolvable:$false] %s568_s15 }
  0x1a   : > { %p566_p3 = pnand %p564_p2, %p552_p1  ;;  %s570_s16 = scalar_lea.vmem %s569_s15, 512 }
  0x1b   : > { %p571_p4 = scmp.lt.s32.totalorder %s147_s4, %s569_s15  ;;  %p572_p6 = scmp.lt.s32.totalorder %s570_s16, %s563_s7 }
  0x1c   : > { %p567_p5 = pneg %p566_p3 }
  0x1d   : > { %p573_p7 = por %p572_p6, %p571_p4 }
  0x1f   : > { %p574_p10 = pnand %p573_p7, %p567_p5 }
  0x21   : > { %577 = shalt.err (!%p574_p10)
}
  0x22   : > { %s693_s18 = smov 128   ;;  %s694_s19 = smov 8  }
  0x23   : > { %488 = dma.hbm_to_vmem [thread:$0]  (!%p787_p13), %s145_s30, 256, %s147_s4, %s134_s6, %s693_s18, %s693_s18, %s694_s19  }
  0x24   : > { %p175_p12 = scmp.lt.s32.totalorder %s690_s14, 4  ;;  %s445_s20 = sshll.u32 %s778_s25, 5 }
  0x25   : > { %s460_s26 = sshll.u32 %s686_s13, 9  ;;  %s160_s7 = scalar_lea.vmem [#allocation5], %s445_s20 }
  0x26   : > { %p805_p2 = pnand %p448_p0, %p175_p12  ;;  %s166_s3 = scalar_lea.hbm %s893_s1, %s460_s26 }
  0x27   : > { %s167_s8 = sshll.u32 %s160_s7, 4  ;;  %s157_s15 = scalar_lea.sflag [#allocation6], %s778_s25  ;;  %s168_s8 = int_to_ptr.vmem [resolvable:$true] %s167_s8 }
  0x28   : > { %s591_s16 = scalar_lea.vmem %s168_s8, 512  ;;  %s695_s30 = smov [#allocation5]  }
  0x29   : > { %p592_p3 = scmp.ne.s32.totalorder %s168_s8, %s591_s16  ;;  %s596_s4 = sshll.u32 %s695_s30, 4  ;;  %s597_s4 = int_to_ptr.vmem [resolvable:$false] %s596_s4 }
  0x2a   : > { %s598_s6 = scalar_lea.vmem %s597_s4, 1024  ;;  %p599_p0 = scmp.lt.s32.totalorder %s168_s8, %s597_s4 }
  0x2b   : > { %p594_p5 = pnand %p592_p3, %p552_p1  ;;  %p600_p6 = scmp.lt.s32.totalorder %s598_s6, %s591_s16 }
  0x2d   : > { %p595_p4 = pneg %p594_p5  ;;  %p601_p7 = por %p600_p6, %p599_p0 }
  0x2f   : > { %p602_p10 = pnand %p601_p7, %p595_p4 }
  0x31   : > { %605 = shalt.err (!%p602_p10)
}
  0x32   : > { %491 = dma.hbm_to_vmem [thread:$0]  (!%p787_p13), %s166_s3, 512, %s168_s8, %s157_s15, %s693_s18, %s693_s18, %s694_s19  }
  0x33   : > { %179 = sbr.rel (%p805_p2) target bundleno = 278 (0x116), region = 28  ;;  %s821_s25 = sand.u32 (!%p805_p2), 1, %s674_s10  }
  0x34   : > { %s449_s20 = sshll.u32 (!%p805_p2), %s821_s25, 4  ;;  %s182_s26 = scalar_lea.sflag (!%p805_p2), [#allocation3], %s821_s25 }
  0x35   : > { %s185_s28 = scalar_lea.vmem (!%p805_p2), [#allocation2], %s449_s20 }
  0x38   : > { %657 = dma.done.wait (%p761_p8), %s182_s26, 256  }
  0x39   : > { %659 = vsyncadd (%p761_p8), %s182_s26, 4294967040  ;;  %s450_s5 = sshll.u32 %s821_s25, 5  ;;  %s191_s18 = scalar_lea.sflag [#allocation6], %s821_s25 }
  0x3a   : > { %s194_s19 = scalar_lea.vmem [#allocation5], %s450_s5 }
  0x3b   : > { %661 = dma.done.wait (%p761_p8), %s191_s18, 512  }
  0x3c   : > { %663 = vsyncadd (%p761_p8), %s191_s18, 4294966784  ;;  %vm228_vm0 = vcmask 261120   ;;  %v227_v0 = vld [vmem:[%s194_s19 + $0x18] sm:$0xff]  ;;  %v226_v1 = vld [vmem:[%s194_s19 + $0x10] sm:$0xff]  ;;  %s219_s21 = scalar_lea.vmem [#allocation7], %s449_s20  ;;  %s461_s29 = sshll.u32 %s682_s12, 8 }
  0x3d   : > { %468 = vmatprep.subr.mxu0 %v227_v0  ;;  %v222_v2 = vld [vmem:[%s185_s28] sm:$0xff]  ;;  %v225_v3 = vld [vmem:[%s194_s19 + $0x8] sm:$0xff]  ;;  %s328_s27 = sshll.u32 %s219_s21, 4  ;;  %s843_s8 = scalar_lea.hbm %s894_s2, %s461_s29  ;;  %s838_s27 = int_to_ptr.vmem [resolvable:$true] %s328_s27 }
  0x3e   : > { %469 = vmatpush3.msra.mxu0 %v227_v0  ;;  %476 = vmatprep.mubr.msk.f32.mxu0 %vm228_vm0, %v222_v2  ;;  %v224_v4 = vld [vmem:[%s194_s19] sm:$0xff]  ;;  %v223_v5 = vld [vmem:[%s185_s28 + $0x8] sm:$0xff]  ;;  %s313_s15 = scalar_lea.sflag [#allocation4], %s821_s25  ;;  %s606_s16 = scalar_lea.vmem %s838_s27, 256 }
  0x3f   : > { %470 = vmatprep.subr.mxu0 %v226_v1  ;;  %p607_p8 = scmp.ne.s32.totalorder %s838_s27, %s606_s16  ;;  %s696_s12 = smov [#allocation7]  }
  0x40   : > { %471 = vmatpush3.msra.mxu0 %v226_v1  ;;  %s610_s30 = sshll.u32 %s696_s12, 4  ;;  %s611_s30 = int_to_ptr.vmem [resolvable:$false] %s610_s30 }
  0x41   : > { %472 = vmatprep.subr.mxu0 %v225_v3  ;;  %p608_p13 = pnand %p607_p8, %p765_p9  ;;  %s612_s4 = scalar_lea.vmem %s611_s30, 512 }
  0x42   : > { %473 = vmatpush3.msra.mxu0 %v225_v3  ;;  %p613_p12 = scmp.lt.s32.totalorder %s838_s27, %s611_s30  ;;  %p614_p2 = scmp.lt.s32.totalorder %s612_s4, %s606_s16 }
  0x43   : > { %474 = vmatprep.subr.mxu0 %v224_v4  ;;  %p609_p1 = pneg %p608_p13 }
  0x44   : > { %475 = vmatpush3.msra.mxu0 %v224_v4  ;;  %p615_p3 = por %p614_p2, %p613_p12 }
  0x45   : > { %477 = vmatmul.mubr.msk.f32.vlgmr.msra.gmra.mxu0 %vm228_vm0, %v223_v5 }
  0x46   : > { %p616_p5 = pnand %p615_p3, %p609_p1 }
 0x105   : > { %v478_v6 = vpop.f32.mrf.mxu0 }
 0x106   : > { %311 = vst.msk [vmem:[%s219_s21 + $0x8] sm:$0xff] %vm228_vm0, %v478_v6 }
 0x107   : > { %v301_v7 = vpop.f32.mrf.mxu0 }
 0x108   : > { %310 = vst.msk [vmem:[%s219_s21] sm:$0xff] %vm228_vm0, %v301_v7 }
 0x109   : > { %619 = shalt.err (!%p616_p5)
}
 0x10a   : > { %s620_s6 = scalar_lea.hbm %s843_s8, 256  ;;  %s624_s28 = scalar_lea.hbm %s894_s2, 768 }
 0x10b   : > { %p621_p4 = scmp.ne.s32.totalorder %s843_s8, %s620_s6  ;;  %p625_p7 = scmp.lt.s32.totalorder %s843_s8, %s894_s2 }
 0x10c   : > { %p626_p10 = scmp.lt.s32.totalorder %s624_s28, %s620_s6 }
 0x10d   : > { %p622_p0 = pnand %p621_p4, %p765_p9 }
 0x10e   : > { %p627_p8 = por %p626_p10, %p625_p7 }
 0x10f   : > { %p623_p6 = pneg %p622_p0 }
 0x111   : > { %p628_p13 = pnand %p627_p8, %p623_p6 }
 0x113   : > { %631 = shalt.err (!%p628_p13)
}
 0x114   : > { %s697_s19 = smov 128   ;;  %s698_s21 = smov 8  }
 0x115   : > { %483 = dma.vmem_to_hbm [thread:$0]  (%p765_p9), %s838_s27, 256, %s843_s8, %s313_s15, %s697_s19, %s697_s19, %s698_s21  }
 0x116 PF: > { %p497_p1 = scmp.ge.s32.totalorder %s690_s14, 2  ;;  %s343_s29 = sand.u32 1, %s670_s9  }
 0x117   : > { %s344_s3 = scalar_lea.sflag [#allocation4], %s343_s29 }
 0x118   : > { %p493_p12 = pnand %p497_p1, %p772_p11 }
 0x11a   : > { %p494_p2 = pneg %p493_p12 }
 0x11c   : > { %665 = dma.done.wait (%p494_p2), %s344_s3, 256  }
 0x11d   : > { %667 = vsyncadd (%p494_p2), %s344_s3, 4294967040  ;;  %s21_s14 = sadd.s32 1, %s690_s14   ;;  %s901_s9 = smov %s674_s10 }
 0x11e   : > { %p18_p3 = scmp.ge.s32.totalorder %s21_s14, 5   ;;  %s902_s10 = smov %s678_s11 }
 0x11f   : > { %s903_s11 = smov %s770_s23  ;;  %s904_s12 = smov %s686_s13 }
 0x120   : > { %s905_s13 = smov %s907_s17  ;;  %20 = sbr.rel (!%p18_p3) target bundleno = 8 (0x8), region = 86 }
 0x125   :  { %349 = vsyncpa [#allocation3], 1 }
 0x126   :  { %351 = vsyncpa [#allocation3 + $0x1], 1 }
 0x127   :  { %352 = vsyncpa [#allocation6], 1 }
 0x128   :  { %354 = vsyncpa [#allocation6 + $0x1], 1 }
 0x129   :  { %355 = vsyncpa [#allocation4], 1 }
 0x12a   :  { %357 = vsyncpa [#allocation4 + $0x1], 1 }

</bundles_post_ra>
